<compile_context>
chip_gen: v7x
topology: tpu7x:2x2x1
jax: 0.10.0
libtpu: 0.0.40
codegen_flags: <defaults>
</compile_context>

<pallas_src>
import numpy as np
import jax
import jax.numpy as jnp
from jax.experimental import pallas as pl
from jax.experimental.pallas import tpu as pltpu


# ----------------------------------------------------------------------------
# small static helpers
# ----------------------------------------------------------------------------
def _round_up(x, m):
    return ((x + m - 1) // m) * m


def _tap_shifts(W):
    """(lane shift, needs_mask) for the 9 taps of a 3x3 same conv, tap-major."""
    taps = []
    for dy in (-1, 0, 1):
        for dx in (-1, 0, 1):
            taps.append((dy * W + dx, not (dy == 0 and dx == 0)))
    return taps


def _build_masks(H, W, hwp, G):
    """Host-built (9, G*hwp) f32 validity masks (1 = in-image neighbour), tiled per image."""
    p = np.arange(hwp)
    y, x = p // W, p % W
    valid = p < H * W
    rows = []
    for dy in (-1, 0, 1):
        for dx in (-1, 0, 1):
            m = valid & (y + dy >= 0) & (y + dy < H) & (x + dx >= 0) & (x + dx < W)
            rows.append(m)
    m9 = np.stack(rows).astype(np.float32)           # (9, hwp)
    return jnp.asarray(np.tile(m9, (1, G)))          # (9, G*hwp)


def _choose_group(N, hwp, slab_rows, budget_bytes=3 << 20):
    """Largest G dividing N s.t. grid >= 2 (when N >= 2) and the slab stays small."""
    best = 1
    for g in range(1, N + 1):
        if N % g:
            continue
        if N >= 2 and N // g < 2:   # keep both v7x TensorCores busy
            continue
        if slab_rows * g * hwp * 4 > budget_bytes:
            continue
        best = g
    return best


# ----------------------------------------------------------------------------
# layout plumbing (wrapper side, XLA)
# ----------------------------------------------------------------------------
def _to_lanes(x_nchw, hwp, cpad):
    """(N, C, H, W) -> (cpad, N*hwp): channel-major, zero-padded channels & spatial."""
    N, C, H, W = x_nchw.shape
    hw = H * W
    x = x_nchw.reshape(N, C, hw)
    if hwp != hw or cpad != C:
        x = jnp.pad(x, ((0, 0), (0, cpad - C), (0, hwp - hw)))
    return jnp.transpose(x, (1, 0, 2)).reshape(cpad, N * hwp)


def _from_lanes(x_cl, N, H, W, hwp, out_dtype):
    """(C, N*hwp) -> (N, C, H, W)."""
    C = x_cl.shape[0]
    x = x_cl.reshape(C, N, hwp)[:, :, : H * W]
    return jnp.transpose(x, (1, 0, 2)).reshape(N, C, H, W).astype(out_dtype)


# ----------------------------------------------------------------------------
# weight preparation (wrapper side)
# ----------------------------------------------------------------------------
def _prep_in_weight(w, b, cv, cinp, cvp):
    """OIHW (cv, cin, 3, 3) -> (cvp, 9, cinp) tap-major, zero-padded; bias -> (cvp, 1)."""
    cin = w.shape[1]
    w9 = jnp.transpose(w, (0, 2, 3, 1)).reshape(cv, 9, cin).astype(jnp.float32)
    w9 = jnp.pad(w9, ((0, cvp - cv), (0, 0), (0, cinp - cin)))
    b9 = jnp.pad(b.reshape(cv, 1).astype(jnp.float32), ((0, cvp - cv), (0, 0)))
    return w9, b9


def _combine_in_weights(w9_list, b_list, cvp, cinp, matmul_dtype):
    """Fuse the (<=2) input convs into one block-diagonal matmul weight.

    Column order = (tap, source, cin) which matches the slab built from
    concat([x_p, x_q], axis=0) rolled per tap.  Rows 0:cvp -> first source's mu,
    rows cvp:2cvp -> second source's mu.
    """
    n = len(w9_list)
    if n == 1:
        w = w9_list[0].reshape(cvp, 9 * cinp)
    else:
        zero = jnp.zeros_like(w9_list[0])
        top = jnp.stack([w9_list[0], zero], axis=2)     # (cvp, 9, 2, cinp)
        bot = jnp.stack([zero, w9_list[1]], axis=2)
        w = jnp.concatenate([top, bot], axis=0).reshape(2 * cvp, 9 * 2 * cinp)
    b = jnp.concatenate(b_list, axis=0)
    return w.astype(matmul_dtype), b


def _prep_out_weight(w, b, cvp, matmul_dtype):
    """conv_out OIHW (cout, cv, 3, 3) -> (cout, 9*cvp) with zero-padded cv columns."""
    cout, cv = w.shape[0], w.shape[1]
    w9 = jnp.transpose(w, (0, 2, 3, 1)).reshape(cout, 9, cv).astype(jnp.float32)
    w9 = jnp.pad(w9, ((0, 0), (0, 0), (0, cvp - cv))).reshape(cout, 9 * cvp)
    return w9.astype(matmul_dtype), b.reshape(cout, 1).astype(jnp.float32)


# ----------------------------------------------------------------------------
# fused kernel
# ----------------------------------------------------------------------------
def _make_kernel(taps, n_srcs, cv, cvp, matmul_dtype):
    """n_srcs = number of activations feeding the fused input conv (0, 1 or 2).
    If 0, the single activation input is the latent z itself (already cvp rows)."""

    def conv3x3(x, w, b, masks):
        # x: (rows, L) f32 with sublane-aligned rows; one MXU matmul per call.
        L = x.shape[-1]
        pieces = []
        for t, (s, needs_mask) in enumerate(taps):
            r = x if s == 0 else pltpu.roll(x, (-s) % L, axis=1)   # XLU lane rotate
            if needs_mask:
                r = r * masks[t:t + 1, :]                          # "same" padding
            pieces.append(r)
        slab = jnp.concatenate(pieces, axis=0).astype(matmul_dtype)
        return jnp.dot(w, slab, preferred_element_type=jnp.float32) + b

    def kernel(*refs):
        mask_ref = refs[0]
        masks = mask_ref[...]                                      # (9, L) f32
        pos = 1
        if n_srcs == 0:
            z = refs[pos][...].astype(jnp.float32)                 # (cvp, L)
            pos += 1
        else:
            xs = [refs[pos + i][...].astype(jnp.float32) for i in range(n_srcs)]
            pos += n_srcs
            w_in, b_in = refs[pos][...], refs[pos + 1][...]
            pos += 2
        w_out, b_out = refs[pos][...], refs[pos + 1][...]
        pos += 2
        out_refs = refs[pos:]

        if n_srcs > 0:
            x_cat = xs[0] if n_srcs == 1 else jnp.concatenate(xs, axis=0)
            mu = conv3x3(x_cat, w_in, b_in, masks)                 # (n_srcs*cvp, L)
            for i in range(n_srcs):
                out_refs[i][...] = mu[i * cvp:i * cvp + cv].astype(out_refs[i].dtype)
            z = mu[(n_srcs - 1) * cvp:n_srcs * cvp]                # latent stays on-chip

        out = conv3x3(z, w_out, b_out, masks)
        out_refs[-1][...] = out.astype(out_refs[-1].dtype)

    return kernel


def _fused_call(masks, acts, w_in, b_in, w_out, b_out, *, taps, n_srcs, cv, cvp,
                cout, G, hwp, N, out_dtype, matmul_dtype):
    L_total = N * hwp
    Lb = G * hwp
    kernel = _make_kernel(taps, n_srcs, cv, cvp, matmul_dtype)

    def const_spec(a):
        return pl.BlockSpec(a.shape, lambda n: (0,) * a.ndim)

    def lane_spec(rows):
        return pl.BlockSpec((rows, Lb), lambda n: (0, n))

    inputs, in_specs = [masks], [const_spec(masks)]
    for a in acts:
        inputs.append(a)
        in_specs.append(lane_spec(a.shape[0]))
    if n_srcs > 0:
        inputs += [w_in, b_in]
        in_specs += [const_spec(w_in), const_spec(b_in)]
    inputs += [w_out, b_out]
    in_specs += [const_spec(w_out), const_spec(b_out)]

    out_shapes, out_specs = [], []
    for _ in range(n_srcs):
        out_shapes.append(jax.ShapeDtypeStruct((cv, L_total), out_dtype))
        out_specs.append(lane_spec(cv))
    out_shapes.append(jax.ShapeDtypeStruct((cout, L_total), out_dtype))
    out_specs.append(lane_spec(cout))

    k_in = w_in.shape[1] if n_srcs > 0 else 0
    flops = 2 * L_total * (n_srcs * cvp * k_in + cout * 9 * cvp)
    bytes_accessed = sum(int(a.size) * a.dtype.itemsize for a in inputs)
    bytes_accessed += sum(int(np.prod(s.shape)) * jnp.dtype(out_dtype).itemsize
                          for s in out_shapes)

    return pl.pallas_call(
        kernel,
        out_shape=tuple(out_shapes),
        grid=(N // G,),
        in_specs=in_specs,
        out_specs=tuple(out_specs),
        compiler_params=pltpu.CompilerParams(
            dimension_semantics=("parallel",),          # batch groups across v7x TCs
            vmem_limit_bytes=32 * 1024 * 1024),
        cost_estimate=pl.CostEstimate(flops=int(flops), transcendentals=0,
                                      bytes_accessed=int(bytes_accessed)),
    )(*inputs)


# ----------------------------------------------------------------------------
# module parameters / forward
# ----------------------------------------------------------------------------
def init_params(key, c_in, c_vars, c_out, kernel=3):
    """Deterministic synthetic parameters in PyTorch Conv2d layout (OIHW)."""
    ks = jax.random.split(key, 6)

    def conv_w(k, cin, cout):
        bound = 1.0 / jnp.sqrt(cin * kernel * kernel)
        return jax.random.uniform(k, (cout, cin, kernel, kernel),
                                  jnp.float32, -bound, bound)

    def conv_b(k, cin, cout):
        bound = 1.0 / jnp.sqrt(cin * kernel * kernel)
        return jax.random.uniform(k, (cout,), jnp.float32, -bound, bound)

    return {
        "w_in_p": conv_w(ks[0], c_in, 2 * c_vars),
        "b_in_p": conv_b(ks[1], c_in, 2 * c_vars),
        "w_in_q": conv_w(ks[2], c_in, 2 * c_vars),
        "b_in_q": conv_b(ks[3], c_in, 2 * c_vars),
        "w_out": conv_w(ks[4], c_vars, c_out),
        "b_out": conv_b(ks[5], c_vars, c_out),
    }


def nonstochastic_block2d_forward(params, p_params, q_params=None,
                                  transform_p_params=True, c_vars=None,
                                  matmul_dtype=jnp.float32):
    """Forward pass matching NonStochasticBlock2d.forward with default flags.

    p_params, q_params: NCHW tensors.  Returns (out [NCHW], data dict).
    matmul_dtype=jnp.bfloat16 uses bf16 MXU operands with f32 accumulation (v6e/v7x).
    """
    # TODO(synk): forced_latent / use_mode / force_constant_output / mode_pred branches,
    # groups>1 convolutions and the odd-spatial-size center-crop of q_mu are not implemented.
    N, _, H, W = p_params.shape
    hw = H * W
    hwp = _round_up(hw, 128)          # lane-dense stores even for non-128-multiple HW
    out_dtype = p_params.dtype

    if c_vars is None:
        c_vars = params["w_out"].shape[1]
    cvp = _round_up(c_vars, 8)

    has_q = q_params is not None
    srcs = []                         # activations feeding the fused input conv
    if transform_p_params:
        srcs.append((p_params, params["w_in_p"][:c_vars], params["b_in_p"][:c_vars]))
    if has_q:
        srcs.append((q_params, params["w_in_q"][:c_vars], params["b_in_q"][:c_vars]))
    n_srcs = len(srcs)

    taps = _tap_shifts(W)

    if n_srcs > 0:
        c_in = srcs[0][1].shape[1]
        cinp = _round_up(c_in, 8)
        slab_rows = max(9 * n_srcs * cinp, 9 * cvp)
    else:
        cinp = cvp
        slab_rows = 9 * cvp
    G = _choose_group(N, hwp, slab_rows)
    masks = _build_masks(H, W, hwp, G)

    if n_srcs > 0:
        acts = [_to_lanes(x, hwp, cinp) for x, _, _ in srcs]
        w9_list, b_list = [], []
        for _, w, b in srcs:
            w9, b9 = _prep_in_weight(w, b, c_vars, cinp, cvp)
            w9_list.append(w9)
            b_list.append(b9)
        w_in, b_in = _combine_in_weights(w9_list, b_list, cvp, cinp, matmul_dtype)
    else:
        # transform_p_params=False and no q: latent is p_params' first c_vars channels.
        acts = [_to_lanes(p_params[:, :c_vars], hwp, cvp)]
        w_in = b_in = None

    w_out, b_out = _prep_out_weight(params["w_out"], params["b_out"], cvp, matmul_dtype)
    cout = params["w_out"].shape[0]

    outs = _fused_call(masks, acts, w_in, b_in, w_out, b_out,
                       taps=taps, n_srcs=n_srcs, cv=c_vars, cvp=cvp, cout=cout,
                       G=G, hwp=hwp, N=N, out_dtype=out_dtype,
                       matmul_dtype=matmul_dtype)

    out = _from_lanes(outs[-1], N, H, W, hwp, out_dtype)

    i = 0
    if transform_p_params:
        p_mu = _from_lanes(outs[i], N, H, W, hwp, out_dtype)
        i += 1
    else:
        p_mu = p_params[:, :c_vars]
    q_mu = None
    if has_q:
        q_mu = _from_lanes(outs[i], N, H, W, hwp, out_dtype)
        i += 1

    z = q_mu if has_q else p_mu
    # Matches the module: debug_qvar_max = torch.Tensor([1]) iff q_params is given, else 0.
    qvar_max = jnp.ones((1,), jnp.float32) if has_q else jnp.zeros((1,), jnp.float32)

    data = {
        "kl_elementwise": None, "kl_samplewise": None,
        "kl_spatial": None, "kl_channelwise": None,
        "z": z,
        "p_params": (p_mu, None),
        "q_params": (q_mu, None) if has_q else None,
        "logprob_q": None,
        "qvar_max": qvar_max,
    }
    return out, data


# ----------------------------------------------------------------------------
# reference & self-test
# ----------------------------------------------------------------------------
def _reference_conv(x_nchw, w_oihw, b):
    out = jax.lax.conv_general_dilated(
        x_nchw, w_oihw, window_strides=(1, 1), padding="SAME",
        dimension_numbers=("NCHW", "OIHW", "NCHW"))
    return out + b[None, :, None, None]


if __name__ == "__main__":
    key = jax.random.PRNGKey(0)
    c_in, c_vars, c_out = 4, 4, 8
    N, H, W = 2, 16, 16

    k_p, k_q, k_params = jax.random.split(key, 3)
    p_in = jax.random.normal(k_p, (N, c_in, H, W), jnp.float32)
    q_in = jax.random.normal(k_q, (N, c_in, H, W), jnp.float32)
    params = init_params(k_params, c_in, c_vars, c_out)

    fwd = jax.jit(nonstochastic_block2d_forward,
                  static_argnames=("transform_p_params", "c_vars", "matmul_dtype"))

    out, data = fwd(params, p_in, q_in, transform_p_params=True, c_vars=c_vars,
                    matmul_dtype=jnp.float32)
    out = jax.block_until_ready(out)

    # Pure-JAX reference of the same forward math.
    p_full_ref = _reference_conv(p_in, params["w_in_p"], params["b_in_p"])
    p_mu_ref = p_full_ref[:, :c_vars]
    q_full_ref = _reference_conv(q_in, params["w_in_q"], params["b_in_q"])
    z_ref = q_full_ref[:, :c_vars]
    out_ref = _reference_conv(z_ref, params["w_out"], params["b_out"])

    assert out.shape == (N, c_out, H, W)
    assert jnp.max(jnp.abs(out - out_ref)) < 1e-4
    assert jnp.max(jnp.abs(data["z"] - z_ref)) < 1e-4
    assert jnp.max(jnp.abs(data["p_params"][0] - p_mu_ref)) < 1e-4
    assert jnp.max(jnp.abs(data["q_params"][0] - z_ref)) < 1e-4

    # bf16-operand MXU path (v6e/v7x): f32 accumulation, looser tolerance.
    out_bf, _ = fwd(params, p_in, q_in, transform_p_params=True, c_vars=c_vars,
                    matmul_dtype=jnp.bfloat16)
    out_bf = jax.block_until_ready(out_bf)
    assert jnp.max(jnp.abs(out_bf - out_ref)) < 1.5e-1

    print("KERNEL_OK")
</pallas_src>

<mosaic_0001>
module attributes {stable_mosaic.version = 11 : i64} {
  func.func @kernel(%arg0: i32, %arg1: memref<9x256xf32, #tpu.memory_space<vmem>>, %arg2: memref<8x256xf32, #tpu.memory_space<vmem>>, %arg3: memref<8x256xf32, #tpu.memory_space<vmem>>, %arg4: memref<16x144xf32, #tpu.memory_space<vmem>>, %arg5: memref<16x1xf32, #tpu.memory_space<vmem>>, %arg6: memref<8x72xf32, #tpu.memory_space<vmem>>, %arg7: memref<8x1xf32, #tpu.memory_space<vmem>>, %arg8: memref<4x256xf32, #tpu.memory_space<vmem>>, %arg9: memref<4x256xf32, #tpu.memory_space<vmem>>, %arg10: memref<8x256xf32, #tpu.memory_space<vmem>>) attributes {dimension_semantics = [#tpu.dimension_semantics<parallel>], iteration_bounds = array<i64: 2>, scalar_prefetch = 0 : i64, scratch_operands = 0 : i64, tpu.core_type = #tpu.core_type<tc>, window_params = [{pipeline_mode = #tpu.pipeline_mode<synchronous>, transform_indices = @transform_0, window_bounds = array<i64: 9, 256>}, {transform_indices = @transform_1, window_bounds = array<i64: 8, 256>}, {transform_indices = @transform_2, window_bounds = array<i64: 8, 256>}, {pipeline_mode = #tpu.pipeline_mode<synchronous>, transform_indices = @transform_3, window_bounds = array<i64: 16, 144>}, {pipeline_mode = #tpu.pipeline_mode<synchronous>, transform_indices = @transform_4, window_bounds = array<i64: 16, 1>}, {pipeline_mode = #tpu.pipeline_mode<synchronous>, transform_indices = @transform_5, window_bounds = array<i64: 8, 72>}, {pipeline_mode = #tpu.pipeline_mode<synchronous>, transform_indices = @transform_6, window_bounds = array<i64: 8, 1>}, {transform_indices = @transform_7, window_bounds = array<i64: 4, 256>}, {transform_indices = @transform_8, window_bounds = array<i64: 4, 256>}, {transform_indices = @transform_9, window_bounds = array<i64: 8, 256>}]} {
    %c0 = arith.constant 0 : index
    %c0_0 = arith.constant 0 : index
    %0 = vector.load %arg1[%c0, %c0_0] : memref<9x256xf32, #tpu.memory_space<vmem>>, vector<9x256xf32>
    %c0_1 = arith.constant 0 : index
    %c0_2 = arith.constant 0 : index
    %1 = vector.load %arg2[%c0_1, %c0_2] : memref<8x256xf32, #tpu.memory_space<vmem>>, vector<8x256xf32>
    %c0_3 = arith.constant 0 : index
    %c0_4 = arith.constant 0 : index
    %2 = vector.load %arg3[%c0_3, %c0_4] : memref<8x256xf32, #tpu.memory_space<vmem>>, vector<8x256xf32>
    %c0_5 = arith.constant 0 : index
    %c0_6 = arith.constant 0 : index
    %3 = vector.load %arg4[%c0_5, %c0_6] : memref<16x144xf32, #tpu.memory_space<vmem>>, vector<16x144xf32>
    %c0_7 = arith.constant 0 : index
    %c0_8 = arith.constant 0 : index
    %4 = vector.load %arg5[%c0_7, %c0_8] : memref<16x1xf32, #tpu.memory_space<vmem>>, vector<16x1xf32>
    %c0_9 = arith.constant 0 : index
    %c0_10 = arith.constant 0 : index
    %5 = vector.load %arg6[%c0_9, %c0_10] : memref<8x72xf32, #tpu.memory_space<vmem>>, vector<8x72xf32>
    %c0_11 = arith.constant 0 : index
    %c0_12 = arith.constant 0 : index
    %6 = vector.load %arg7[%c0_11, %c0_12] : memref<8x1xf32, #tpu.memory_space<vmem>>, vector<8x1xf32>
    %7 = tpu.concatenate %1, %2 in 0 : vector<8x256xf32>, vector<8x256xf32> -> vector<16x256xf32>
    %c17_i32 = arith.constant 17 : i32
    %8 = tpu.dynamic_rotate %7 by %c17_i32 dim 1 : vector<16x256xf32>, i32 -> vector<16x256xf32>
    %9 = vector.extract_strided_slice %0 {offsets = [0, 0], sizes = [1, 256], strides = [1, 1]} : vector<9x256xf32> to vector<1x256xf32>
    %10 = vector.broadcast %9 : vector<1x256xf32> to vector<16x256xf32>
    %11 = arith.mulf %8, %10 : vector<16x256xf32>
    %c16_i32 = arith.constant 16 : i32
    %12 = tpu.dynamic_rotate %7 by %c16_i32 dim 1 : vector<16x256xf32>, i32 -> vector<16x256xf32>
    %13 = vector.extract_strided_slice %0 {offsets = [1, 0], sizes = [1, 256], strides = [1, 1]} : vector<9x256xf32> to vector<1x256xf32>
    %14 = vector.broadcast %13 : vector<1x256xf32> to vector<16x256xf32>
    %15 = arith.mulf %12, %14 : vector<16x256xf32>
    %c15_i32 = arith.constant 15 : i32
    %16 = tpu.dynamic_rotate %7 by %c15_i32 dim 1 : vector<16x256xf32>, i32 -> vector<16x256xf32>
    %17 = vector.extract_strided_slice %0 {offsets = [2, 0], sizes = [1, 256], strides = [1, 1]} : vector<9x256xf32> to vector<1x256xf32>
    %18 = vector.broadcast %17 : vector<1x256xf32> to vector<16x256xf32>
    %19 = arith.mulf %16, %18 : vector<16x256xf32>
    %c1_i32 = arith.constant 1 : i32
    %20 = tpu.dynamic_rotate %7 by %c1_i32 dim 1 : vector<16x256xf32>, i32 -> vector<16x256xf32>
    %21 = vector.extract_strided_slice %0 {offsets = [3, 0], sizes = [1, 256], strides = [1, 1]} : vector<9x256xf32> to vector<1x256xf32>
    %22 = vector.broadcast %21 : vector<1x256xf32> to vector<16x256xf32>
    %23 = arith.mulf %20, %22 : vector<16x256xf32>
    %c255_i32 = arith.constant 255 : i32
    %24 = tpu.dynamic_rotate %7 by %c255_i32 dim 1 : vector<16x256xf32>, i32 -> vector<16x256xf32>
    %25 = vector.extract_strided_slice %0 {offsets = [5, 0], sizes = [1, 256], strides = [1, 1]} : vector<9x256xf32> to vector<1x256xf32>
    %26 = vector.broadcast %25 : vector<1x256xf32> to vector<16x256xf32>
    %27 = arith.mulf %24, %26 : vector<16x256xf32>
    %c241_i32 = arith.constant 241 : i32
    %28 = tpu.dynamic_rotate %7 by %c241_i32 dim 1 : vector<16x256xf32>, i32 -> vector<16x256xf32>
    %29 = vector.extract_strided_slice %0 {offsets = [6, 0], sizes = [1, 256], strides = [1, 1]} : vector<9x256xf32> to vector<1x256xf32>
    %30 = vector.broadcast %29 : vector<1x256xf32> to vector<16x256xf32>
    %31 = arith.mulf %28, %30 : vector<16x256xf32>
    %c240_i32 = arith.constant 240 : i32
    %32 = tpu.dynamic_rotate %7 by %c240_i32 dim 1 : vector<16x256xf32>, i32 -> vector<16x256xf32>
    %33 = vector.extract_strided_slice %0 {offsets = [7, 0], sizes = [1, 256], strides = [1, 1]} : vector<9x256xf32> to vector<1x256xf32>
    %34 = vector.broadcast %33 : vector<1x256xf32> to vector<16x256xf32>
    %35 = arith.mulf %32, %34 : vector<16x256xf32>
    %c239_i32 = arith.constant 239 : i32
    %36 = tpu.dynamic_rotate %7 by %c239_i32 dim 1 : vector<16x256xf32>, i32 -> vector<16x256xf32>
    %37 = vector.extract_strided_slice %0 {offsets = [8, 0], sizes = [1, 256], strides = [1, 1]} : vector<9x256xf32> to vector<1x256xf32>
    %38 = vector.broadcast %37 : vector<1x256xf32> to vector<16x256xf32>
    %39 = arith.mulf %36, %38 : vector<16x256xf32>
    %40 = tpu.concatenate %11, %15, %19, %23, %7, %27, %31, %35, %39 in 0 : vector<16x256xf32>, vector<16x256xf32>, vector<16x256xf32>, vector<16x256xf32>, vector<16x256xf32>, vector<16x256xf32>, vector<16x256xf32>, vector<16x256xf32>, vector<16x256xf32> -> vector<144x256xf32>
    %cst = arith.constant dense<0.000000e+00> : vector<16x256xf32>
    %41 = tpu.matmul %3, %40, %cst {dimension_numbers = #tpu.dot_dimension_numbers<[1], [0], [0], [1], [0, 0, 1, 1], [], []>} : vector<16x144xf32>, vector<144x256xf32>, vector<16x256xf32> -> vector<16x256xf32>
    %42 = vector.broadcast %4 : vector<16x1xf32> to vector<16x256xf32>
    %43 = arith.addf %41, %42 : vector<16x256xf32>
    %44 = vector.extract_strided_slice %43 {offsets = [0, 0], sizes = [4, 256], strides = [1, 1]} : vector<16x256xf32> to vector<4x256xf32>
    %c0_13 = arith.constant 0 : index
    %c0_14 = arith.constant 0 : index
    %45 = vector.load %arg8[%c0_13, %c0_14] : memref<4x256xf32, #tpu.memory_space<vmem>>, vector<4x256xf32>
    tpu.vector_store %arg8[%c0_13, %c0_14], %44 {strides = array<i32>} : memref<4x256xf32, #tpu.memory_space<vmem>>, vector<4x256xf32>,
    %46 = vector.extract_strided_slice %43 {offsets = [8, 0], sizes = [4, 256], strides = [1, 1]} : vector<16x256xf32> to vector<4x256xf32>
    %c0_15 = arith.constant 0 : index
    %c0_16 = arith.constant 0 : index
    %47 = vector.load %arg9[%c0_15, %c0_16] : memref<4x256xf32, #tpu.memory_space<vmem>>, vector<4x256xf32>
    tpu.vector_store %arg9[%c0_15, %c0_16], %46 {strides = array<i32>} : memref<4x256xf32, #tpu.memory_space<vmem>>, vector<4x256xf32>,
    %48 = vector.extract_strided_slice %43 {offsets = [8, 0], sizes = [8, 256], strides = [1, 1]} : vector<16x256xf32> to vector<8x256xf32>
    %c17_i32_17 = arith.constant 17 : i32
    %49 = tpu.dynamic_rotate %48 by %c17_i32_17 dim 1 : vector<8x256xf32>, i32 -> vector<8x256xf32>
    %50 = vector.extract_strided_slice %0 {offsets = [0, 0], sizes = [1, 256], strides = [1, 1]} : vector<9x256xf32> to vector<1x256xf32>
    %51 = vector.broadcast %50 : vector<1x256xf32> to vector<8x256xf32>
    %52 = arith.mulf %49, %51 : vector<8x256xf32>
    %c16_i32_18 = arith.constant 16 : i32
    %53 = tpu.dynamic_rotate %48 by %c16_i32_18 dim 1 : vector<8x256xf32>, i32 -> vector<8x256xf32>
    %54 = vector.extract_strided_slice %0 {offsets = [1, 0], sizes = [1, 256], strides = [1, 1]} : vector<9x256xf32> to vector<1x256xf32>
    %55 = vector.broadcast %54 : vector<1x256xf32> to vector<8x256xf32>
    %56 = arith.mulf %53, %55 : vector<8x256xf32>
    %c15_i32_19 = arith.constant 15 : i32
    %57 = tpu.dynamic_rotate %48 by %c15_i32_19 dim 1 : vector<8x256xf32>, i32 -> vector<8x256xf32>
    %58 = vector.extract_strided_slice %0 {offsets = [2, 0], sizes = [1, 256], strides = [1, 1]} : vector<9x256xf32> to vector<1x256xf32>
    %59 = vector.broadcast %58 : vector<1x256xf32> to vector<8x256xf32>
    %60 = arith.mulf %57, %59 : vector<8x256xf32>
    %c1_i32_20 = arith.constant 1 : i32
    %61 = tpu.dynamic_rotate %48 by %c1_i32_20 dim 1 : vector<8x256xf32>, i32 -> vector<8x256xf32>
    %62 = vector.extract_strided_slice %0 {offsets = [3, 0], sizes = [1, 256], strides = [1, 1]} : vector<9x256xf32> to vector<1x256xf32>
    %63 = vector.broadcast %62 : vector<1x256xf32> to vector<8x256xf32>
    %64 = arith.mulf %61, %63 : vector<8x256xf32>
    %c255_i32_21 = arith.constant 255 : i32
    %65 = tpu.dynamic_rotate %48 by %c255_i32_21 dim 1 : vector<8x256xf32>, i32 -> vector<8x256xf32>
    %66 = vector.extract_strided_slice %0 {offsets = [5, 0], sizes = [1, 256], strides = [1, 1]} : vector<9x256xf32> to vector<1x256xf32>
    %67 = vector.broadcast %66 : vector<1x256xf32> to vector<8x256xf32>
    %68 = arith.mulf %65, %67 : vector<8x256xf32>
    %c241_i32_22 = arith.constant 241 : i32
    %69 = tpu.dynamic_rotate %48 by %c241_i32_22 dim 1 : vector<8x256xf32>, i32 -> vector<8x256xf32>
    %70 = vector.extract_strided_slice %0 {offsets = [6, 0], sizes = [1, 256], strides = [1, 1]} : vector<9x256xf32> to vector<1x256xf32>
    %71 = vector.broadcast %70 : vector<1x256xf32> to vector<8x256xf32>
    %72 = arith.mulf %69, %71 : vector<8x256xf32>
    %c240_i32_23 = arith.constant 240 : i32
    %73 = tpu.dynamic_rotate %48 by %c240_i32_23 dim 1 : vector<8x256xf32>, i32 -> vector<8x256xf32>
    %74 = vector.extract_strided_slice %0 {offsets = [7, 0], sizes = [1, 256], strides = [1, 1]} : vector<9x256xf32> to vector<1x256xf32>
    %75 = vector.broadcast %74 : vector<1x256xf32> to vector<8x256xf32>
    %76 = arith.mulf %73, %75 : vector<8x256xf32>
    %c239_i32_24 = arith.constant 239 : i32
    %77 = tpu.dynamic_rotate %48 by %c239_i32_24 dim 1 : vector<8x256xf32>, i32 -> vector<8x256xf32>
    %78 = vector.extract_strided_slice %0 {offsets = [8, 0], sizes = [1, 256], strides = [1, 1]} : vector<9x256xf32> to vector<1x256xf32>
    %79 = vector.broadcast %78 : vector<1x256xf32> to vector<8x256xf32>
    %80 = arith.mulf %77, %79 : vector<8x256xf32>
    %81 = tpu.concatenate %52, %56, %60, %64, %48, %68, %72, %76, %80 in 0 : vector<8x256xf32>, vector<8x256xf32>, vector<8x256xf32>, vector<8x256xf32>, vector<8x256xf32>, vector<8x256xf32>, vector<8x256xf32>, vector<8x256xf32>, vector<8x256xf32> -> vector<72x256xf32>
    %cst_25 = arith.constant dense<0.000000e+00> : vector<8x256xf32>
    %82 = tpu.matmul %5, %81, %cst_25 {dimension_numbers = #tpu.dot_dimension_numbers<[1], [0], [0], [1], [0, 0, 1, 1], [], []>} : vector<8x72xf32>, vector<72x256xf32>, vector<8x256xf32> -> vector<8x256xf32>
    %83 = vector.broadcast %6 : vector<8x1xf32> to vector<8x256xf32>
    %84 = arith.addf %82, %83 : vector<8x256xf32>
    %c0_26 = arith.constant 0 : index
    %c0_27 = arith.constant 0 : index
    %85 = vector.load %arg10[%c0_26, %c0_27] : memref<8x256xf32, #tpu.memory_space<vmem>>, vector<8x256xf32>
    tpu.vector_store %arg10[%c0_26, %c0_27], %84 {strides = array<i32>} : memref<8x256xf32, #tpu.memory_space<vmem>>, vector<8x256xf32>,
    return
  }
  func.func @transform_0(%arg0: i32) -> (i32, i32) {
    %c0_i32 = arith.constant 0 : i32
    %c0_i32_0 = arith.constant 0 : i32
    %c0_i32_1 = arith.constant 0 : i32
    return %c0_i32, %c0_i32_0 : i32, i32
  }
  func.func @transform_1(%arg0: i32) -> (i32, i32) {
    %c0_i32 = arith.constant 0 : i32
    %c0_i32_0 = arith.constant 0 : i32
    return %c0_i32, %arg0 : i32, i32
  }
  func.func @transform_2(%arg0: i32) -> (i32, i32) {
    %c0_i32 = arith.constant 0 : i32
    %c0_i32_0 = arith.constant 0 : i32
    return %c0_i32, %arg0 : i32, i32
  }
  func.func @transform_3(%arg0: i32) -> (i32, i32) {
    %c0_i32 = arith.constant 0 : i32
    %c0_i32_0 = arith.constant 0 : i32
    %c0_i32_1 = arith.constant 0 : i32
    return %c0_i32, %c0_i32_0 : i32, i32
  }
  func.func @transform_4(%arg0: i32) -> (i32, i32) {
    %c0_i32 = arith.constant 0 : i32
    %c0_i32_0 = arith.constant 0 : i32
    %c0_i32_1 = arith.constant 0 : i32
    return %c0_i32, %c0_i32_0 : i32, i32
  }
  func.func @transform_5(%arg0: i32) -> (i32, i32) {
    %c0_i32 = arith.constant 0 : i32
    %c0_i32_0 = arith.constant 0 : i32
    %c0_i32_1 = arith.constant 0 : i32
    return %c0_i32, %c0_i32_0 : i32, i32
  }
  func.func @transform_6(%arg0: i32) -> (i32, i32) {
    %c0_i32 = arith.constant 0 : i32
    %c0_i32_0 = arith.constant 0 : i32
    %c0_i32_1 = arith.constant 0 : i32
    return %c0_i32, %c0_i32_0 : i32, i32
  }
  func.func @transform_7(%arg0: i32) -> (i32, i32) {
    %c0_i32 = arith.constant 0 : i32
    %c0_i32_0 = arith.constant 0 : i32
    return %c0_i32, %arg0 : i32, i32
  }
  func.func @transform_8(%arg0: i32) -> (i32, i32) {
    %c0_i32 = arith.constant 0 : i32
    %c0_i32_0 = arith.constant 0 : i32
    return %c0_i32, %arg0 : i32, i32
  }
  func.func @transform_9(%arg0: i32) -> (i32, i32) {
    %c0_i32 = arith.constant 0 : i32
    %c0_i32_0 = arith.constant 0 : i32
    return %c0_i32, %arg0 : i32, i32
  }
}

</mosaic_0001>

<bundles_post_ra>
// kernel: nonstochastic_block2d_forward.1
= control target key start
LH: loop header
LB: loop body
LE: loop exit
PB: predicated region body
PF: predicated region fallthrough
CT: control target
= control target key end

     0   :  { %s1151_s30 = smov 0   ;;  %s1569_s0 = inlined_call_operand.vmem [shape: f32[9,256], index: 0, kind: input, shape index: {}]   ;;  %s1570_s1 = inlined_call_operand.vmem [shape: f32[8,512], index: 1, kind: input, shape index: {}]   ;;  %s1571_s2 = inlined_call_operand.vmem [shape: f32[8,512], index: 2, kind: input, shape index: {}]   ;;  %s1572_s3 = inlined_call_operand.vmem [shape: f32[16,144], index: 3, kind: input, shape index: {}]   ;;  %s1573_s4 = inlined_call_operand.vmem [shape: f32[16,1], index: 4, kind: input, shape index: {}]   ;;  %s1574_s5 = inlined_call_operand.vmem [shape: f32[8,72], index: 5, kind: input, shape index: {}]   ;;  %s1575_s6 = inlined_call_operand.vmem [shape: f32[8,1], index: 6, kind: input, shape index: {}]   ;;  %s1576_s7 = inlined_call_operand.vmem [shape: f32[4,512], index: 7, kind: output, shape index: {0}]   ;;  %s1577_s8 = inlined_call_operand.vmem [shape: f32[4,512], index: 8, kind: output, shape index: {1}]   ;;  %s1578_s9 = inlined_call_operand.vmem [shape: f32[8,512], index: 9, kind: output, shape index: {2}]  }
   0x1 LB: > { %s989_s10 = sadd.s32 4294967295, %s1089_s30   ;;  %p993_p0 = scmp.ge.s32.totalorder %s1089_s30, 1  ;;  %s1089_s30 = sphi %s1151_s30, %s20_s30  }
   0x2   : > { %p304_p1 = scmp.lt.s32.totalorder %s1089_s30, 3 }
   0x4   : > { %p305_p2 = pnand %p993_p0, %p304_p1 }
   0x5   : > { %s994_s11 = sshll.u32 (!%p305_p2), %s989_s10, 1  ;;  %s1091_s19 = smov (!%p305_p2), 17   ;;  %v394_v6 = vld [vmem:[%s1572_s3 + $0x8] sm:$0xff] (!%p305_p2)  ;;  %vm613_vm0 = vcmask (!%p305_p2), 130048   ;;  %v1099_v7 = vmov (!%p305_p2), 0   ;;  %v409_v9 = vlaneseq (!%p305_p2)  ;;  %v1263_v13 = vld [vmem:[%s1569_s0] sm:$0xff] (!%p305_p2) }
   0x6   : > { %308 = sbr.rel (%p305_p2) target bundleno = 789 (0x315), region = 48  ;;  %p356_p3 = scmp.lt.s32.totalorder (!%p305_p2), %s994_s11, 3  ;;  %1006 = vmatprep.mubr.msk.f32.mxu0 (!%p305_p2), %vm613_vm0, %v394_v6  ;;  %1081 = vset.pattern.permute.xlu0 (!%p305_p2), %v1099_v7  ;;  %v398_v8 = vld [vmem:[%s1573_s4 + $0x8] sm:$0xff] (!%p305_p2)  ;;  %vm776_vm9 = vcmask (!%p305_p2), 588800  }
   0x7   : > { %s1092_s20 = smov (!%p305_p2), 16   ;;  %s1093_s21 = smov (!%p305_p2), 15   ;;  %1082 = vset.pattern.permute.xlu1 (!%p305_p2), %v1099_v7  ;;  %v1255_v10 = vshrl.u32 (!%p305_p2), %v409_v9, 7  ;;  %v1257_v11 = vand.u32 (!%p305_p2), 127, %v409_v9  ;;  %v1268_v14 = vld [vmem:[%s1569_s0 + $0x8] sm:$0xff] (!%p305_p2) }
   0x8   : > { %s1094_s22 = smov (!%p305_p2), 1   ;;  %s1095_s23 = smov (!%p305_p2), 127  }
   0x9   : > { %s1096_s24 = smov (!%p305_p2), 113   ;;  %s1097_s25 = smov (!%p305_p2), 112   ;;  %v418_v12 = vsub.s32 (!%p305_p2), 0, %v1255_v10  ;;  %vm411_vm1 = vcmp.lt.s32.totalorder (!%p305_p2), %v1257_v11, 17  ;;  %v443_v25 = vsub.s32 (!%p305_p2), 1, %v1255_v10  ;;  %vm436_vm2 = vcmp.lt.s32.totalorder (!%p305_p2), %v1257_v11, 16 }
   0xa   : > { %s1098_s28 = smov (!%p305_p2), 111   ;;  %v468_v38 = vsub.s32 (!%p305_p2), 2, %v1255_v10  ;;  %vm461_vm3 = vcmp.lt.s32.totalorder (!%p305_p2), %v1257_v11, 15  ;;  %v493_v55 = vsub.s32 (!%p305_p2), 3, %v1255_v10  ;;  %vm486_vm4 = vcmp.lt.s32.totalorder (!%p305_p2), %v1257_v11, 1 }
   0xb   : > { %v1272_v17 = vrot.slane (!%p305_p2), %v1263_v13, %v418_v12  ;;  %v1275_v18 = vrot.slane (!%p305_p2), %v1268_v14, %v418_v12  ;;  %v1292_v34 = vrot.slane (!%p305_p2), %v1263_v13, %v443_v25  ;;  %v1295_v35 = vrot.slane (!%p305_p2), %v1268_v14, %v443_v25 }
   0xc   : > { %v1312_v51 = vrot.slane (!%p305_p2), %v1263_v13, %v468_v38  ;;  %v1315_v52 = vrot.slane (!%p305_p2), %v1268_v14, %v468_v38  ;;  %v1332_v12 = vrot.slane (!%p305_p2), %v1263_v13, %v493_v55  ;;  %vm511_vm5 = vcmp.lt.s32.totalorder (!%p305_p2), %v1257_v11, 127 }
   0xd   : > { %s1580_s11 = smov (!%p356_p3, %s994_s11), 3  ;;  %vm536_vm6 = vcmp.lt.s32.totalorder %v1257_v11, 113  ;;  %vm561_vm7 = vcmp.lt.s32.totalorder %v1257_v11, 112  ;;  %vm586_vm8 = vcmp.lt.s32.totalorder %v1257_v11, 111 }
   0xe   : > { %s1162_s12 = sshll.u32 %s1580_s11, 3  ;;  %s999_s17 = sshll.u32 %s1580_s11, 2 }
   0xf   : > { %s359_s15 = scalar_lea.vmem %s1570_s1, %s1162_s12  ;;  %s365_s18 = scalar_lea.vmem %s1571_s2, %s1162_s12 }
  0x10   : > { %v1172_v0 = vld [vmem:[%s359_s15 + $0x8] sm:$0xff]  ;;  %v1174_v1 = vld [vmem:[%s359_s15] sm:$0xff]  ;;  %s377_s27 = scalar_lea.vmem %s1577_s8, %s999_s17  ;;  %s371_s29 = scalar_lea.vmem %s1576_s7, %s999_s17 }
  0x11   : > { %405 = vrot.lane.b32.xlu1 %v1172_v0, %s1091_s19  ;;  %401 = vrot.lane.b32.xlu0 %v1174_v1, %s1091_s19  ;;  %v1180_v2 = vld [vmem:[%s365_s18 + $0x8] sm:$0xff]  ;;  %v1182_v3 = vld [vmem:[%s365_s18] sm:$0xff]  ;;  %s383_s14 = scalar_lea.vmem %s1578_s9, %s1162_s12 }
  0x12   : > { %v1027_v4 = vpack.c.bf16 %v1180_v2, %v1172_v0  ;;  %v1029_v5 = vpack.c.bf16 %v1182_v3, %v1174_v1 }
  0x15   : > { %407 = vrot.lane.b32.xlu1 %v1180_v2, %s1091_s19  ;;  %403 = vrot.lane.b32.xlu0 %v1182_v3, %s1091_s19 }
  0x19   : > { %430 = vrot.lane.b32.xlu1 %v1182_v3, %s1092_s20  ;;  %428 = vrot.lane.b32.xlu0 %v1174_v1, %s1092_s20 }
  0x1d   : > { %434 = vrot.lane.b32.xlu1 %v1180_v2, %s1092_s20  ;;  %432 = vrot.lane.b32.xlu0 %v1172_v0, %s1092_s20 }
  0x21   : > { %455 = vrot.lane.b32.xlu1 %v1182_v3, %s1093_s21  ;;  %453 = vrot.lane.b32.xlu0 %v1174_v1, %s1093_s21 }
  0x25   : > { %459 = vrot.lane.b32.xlu1 %v1180_v2, %s1093_s21  ;;  %457 = vrot.lane.b32.xlu0 %v1172_v0, %s1093_s21 }
  0x29   : > { %480 = vrot.lane.b32.xlu1 %v1182_v3, %s1094_s22  ;;  %478 = vrot.lane.b32.xlu0 %v1174_v1, %s1094_s22 }
  0x2d   : > { %484 = vrot.lane.b32.xlu1 %v1180_v2, %s1094_s22  ;;  %482 = vrot.lane.b32.xlu0 %v1172_v0, %s1094_s22 }
  0x31   : > { %505 = vrot.lane.b32.xlu1 %v1182_v3, %s1095_s23  ;;  %503 = vrot.lane.b32.xlu0 %v1174_v1, %s1095_s23 }
  0x35   : > { %509 = vrot.lane.b32.xlu1 %v1180_v2, %s1095_s23  ;;  %507 = vrot.lane.b32.xlu0 %v1172_v0, %s1095_s23 }
  0x39   : > { %530 = vrot.lane.b32.xlu1 %v1182_v3, %s1096_s24  ;;  %528 = vrot.lane.b32.xlu0 %v1174_v1, %s1096_s24 }
  0x3d   : > { %534 = vrot.lane.b32.xlu1 %v1180_v2, %s1096_s24  ;;  %532 = vrot.lane.b32.xlu0 %v1172_v0, %s1096_s24 }
  0x41   : > { %555 = vrot.lane.b32.xlu1 %v1182_v3, %s1097_s25  ;;  %553 = vrot.lane.b32.xlu0 %v1174_v1, %s1097_s25 }
  0x45   : > { %559 = vrot.lane.b32.xlu1 %v1180_v2, %s1097_s25  ;;  %557 = vrot.lane.b32.xlu0 %v1172_v0, %s1097_s25 }
  0x49   : > { %580 = vrot.lane.b32.xlu1 %v1182_v3, %s1098_s28  ;;  %578 = vrot.lane.b32.xlu0 %v1174_v1, %s1098_s28 }
  0x4d   : > { %584 = vrot.lane.b32.xlu1 %v1180_v2, %s1098_s28  ;;  %582 = vrot.lane.b32.xlu0 %v1172_v0, %s1098_s28 }
  0x51   : > { %610 = vperm.xlu0 %1081, %v398_v8  }
  0x83   : > { %v406_v15 = vpop.permute.xlu1 %405  ;;  %v402_v16 = vpop.permute.xlu0 %401 }
  0x84   : > { %v412_v19 = vsel %vm411_vm1, %v402_v16, %v406_v15  ;;  %v414_v20 = vsel %vm411_vm1, %v406_v15, %v402_v16  ;;  %v1335_v15 = vrot.slane %v1268_v14, %v493_v55  ;;  %v568_v55 = vsub.s32 7, %v1255_v10 }
  0x85   : > { %v424_v26 = vmul.f32 %v1272_v17, %v414_v20  ;;  %v425_v28 = vmul.f32 %v1275_v18, %v412_v19  ;;  %v518_v20 = vsub.s32 5, %v1255_v10 }
  0x87   : > { %v408_v21 = vpop.permute.xlu1 %407  ;;  %v404_v22 = vpop.permute.xlu0 %403 }
  0x88   : > { %v413_v23 = vsel %vm411_vm1, %v404_v22, %v408_v21  ;;  %v415_v24 = vsel %vm411_vm1, %v408_v21, %v404_v22 }
  0x89   : > { %v426_v27 = vmul.f32 %v1272_v17, %v415_v24  ;;  %v427_v29 = vmul.f32 %v1275_v18, %v413_v23 }
  0x8b   : > { %v431_v30 = vpop.permute.xlu1 %430  ;;  %v429_v31 = vpop.permute.xlu0 %428  ;;  %v1011_v32 = vpack.c.bf16 %v427_v29, %v425_v28  ;;  %v1013_v33 = vpack.c.bf16 %v426_v27, %v424_v26 }
  0x8d   : > { %1012 = vmatprep.subr.bf16.mxu0 %v1011_v32 }
  0x8e   : > { %1014 = vmatpush1.bf16.msra.mxu0 %v1013_v33  ;;  %v1352_v33 = vrot.slane %v1263_v13, %v518_v20 }
  0x8f   : > { %v435_v36 = vpop.permute.xlu1 %434  ;;  %v433_v37 = vpop.permute.xlu0 %432 }
  0x90   : > { %v438_v39 = vsel %vm436_vm2, %v431_v30, %v435_v36  ;;  %v440_v40 = vsel %vm436_vm2, %v435_v36, %v431_v30  ;;  %v437_v41 = vsel %vm436_vm2, %v429_v31, %v433_v37  ;;  %v439_v42 = vsel %vm436_vm2, %v433_v37, %v429_v31 }
  0x91   : > { %v451_v43 = vmul.f32 %v1292_v34, %v440_v40  ;;  %v452_v44 = vmul.f32 %v1295_v35, %v438_v39  ;;  %v449_v45 = vmul.f32 %v1292_v34, %v439_v42  ;;  %v450_v46 = vmul.f32 %v1295_v35, %v437_v41 }
  0x92   : > { %v1355_v36 = vrot.slane %v1268_v14, %v518_v20  ;;  %v543_v39 = vsub.s32 6, %v1255_v10 }
  0x93   : > { %v456_v47 = vpop.permute.xlu1 %455  ;;  %v454_v48 = vpop.permute.xlu0 %453  ;;  %v1015_v49 = vpack.c.bf16 %v452_v44, %v450_v46  ;;  %v1017_v50 = vpack.c.bf16 %v451_v43, %v449_v45 }
  0x95   : > { %1016 = vmatprep.subr.bf16.mxu0 %v1015_v49  ;;  %v1378_v49 = vrot.slane %v1263_v13, %v543_v39 }
  0x96   : > { %1018 = vmatpush1.bf16.msra.mxu0 %v1017_v50  ;;  %v1381_v50 = vrot.slane %v1268_v14, %v543_v39 }
  0x97   : > { %v460_v53 = vpop.permute.xlu1 %459  ;;  %v458_v54 = vpop.permute.xlu0 %457 }
  0x98   : > { %v463_v56 = vsel %vm461_vm3, %v456_v47, %v460_v53  ;;  %v465_v57 = vsel %vm461_vm3, %v460_v53, %v456_v47  ;;  %v462_v58 = vsel %vm461_vm3, %v454_v48, %v458_v54  ;;  %v464_v59 = vsel %vm461_vm3, %v458_v54, %v454_v48 }
  0x99   : > { %v476_v60 = vmul.f32 %v1312_v51, %v465_v57  ;;  %v477_v61 = vmul.f32 %v1315_v52, %v463_v56  ;;  %v474_v62 = vmul.f32 %v1312_v51, %v464_v59  ;;  %v475_v63 = vmul.f32 %v1315_v52, %v462_v58 }
  0x9b   : > { %v481_v6 = vpop.permute.xlu1 %480  ;;  %v479_v7 = vpop.permute.xlu0 %478  ;;  %v1019_v8 = vpack.c.bf16 %v477_v61, %v475_v63  ;;  %v1021_v9 = vpack.c.bf16 %v476_v60, %v474_v62 }
  0x9d   : > { %1020 = vmatprep.subr.bf16.mxu0 %v1019_v8 }
  0x9e   : > { %1022 = vmatpush1.bf16.msra.mxu0 %v1021_v9 }
  0x9f   : > { %v485_v16 = vpop.permute.xlu1 %484  ;;  %v483_v19 = vpop.permute.xlu0 %482 }
  0xa0   : > { %v488_v21 = vsel %vm486_vm4, %v481_v6, %v485_v16  ;;  %v490_v22 = vsel %vm486_vm4, %v485_v16, %v481_v6  ;;  %v487_v23 = vsel %vm486_vm4, %v479_v7, %v483_v19  ;;  %v489_v24 = vsel %vm486_vm4, %v483_v19, %v479_v7 }
  0xa1   : > { %v501_v25 = vmul.f32 %v1332_v12, %v490_v22  ;;  %v502_v26 = vmul.f32 %v1335_v15, %v488_v21  ;;  %v499_v27 = vmul.f32 %v1332_v12, %v489_v24  ;;  %v500_v28 = vmul.f32 %v1335_v15, %v487_v23 }
  0xa2   : > { %v1398_v6 = vrot.slane %v1263_v13, %v568_v55  ;;  %v1401_v7 = vrot.slane %v1268_v14, %v568_v55 }
  0xa3   : > { %v506_v29 = vpop.permute.xlu1 %505  ;;  %v504_v30 = vpop.permute.xlu0 %503  ;;  %v1023_v31 = vpack.c.bf16 %v502_v26, %v500_v28  ;;  %v1025_v32 = vpack.c.bf16 %v501_v25, %v499_v27  ;;  %v1419_v28 = vld [vmem:[%s1569_s0 + $0x10] ss:$0 sm:$0xff] }
  0xa5   : > { %1024 = vmatprep.subr.bf16.mxu0 %v1023_v31 }
  0xa6   : > { %1026 = vmatpush1.bf16.msra.mxu0 %v1025_v32 }
  0xa7   : > { %v510_v37 = vpop.permute.xlu1 %509  ;;  %v508_v38 = vpop.permute.xlu0 %507  ;;  %1028 = vmatprep.subr.bf16.mxu0 %v1027_v4 }
  0xa8   : > { %v513_v40 = vsel %vm511_vm5, %v506_v29, %v510_v37  ;;  %v515_v41 = vsel %vm511_vm5, %v510_v37, %v506_v29  ;;  %v512_v42 = vsel %vm511_vm5, %v504_v30, %v508_v38  ;;  %v514_v43 = vsel %vm511_vm5, %v508_v38, %v504_v30  ;;  %v1424_v29 = vld [vmem:[%s1569_s0 + $0x18] ss:$0 sm:$0xff] }
  0xa9   : > { %v526_v44 = vmul.f32 %v1352_v33, %v513_v40  ;;  %v527_v45 = vmul.f32 %v1355_v36, %v515_v41  ;;  %v524_v0 = vmul.f32 %v1352_v33, %v512_v42  ;;  %v525_v2 = vmul.f32 %v1355_v36, %v514_v43 }
  0xaa   : > { %1030 = vmatpush1.bf16.msra.mxu0 %v1029_v5 }
  0xab   : > { %v531_v4 = vpop.permute.xlu1 %530  ;;  %v529_v46 = vpop.permute.xlu0 %528  ;;  %v1031_v47 = vpack.c.bf16 %v527_v45, %v525_v2  ;;  %v1033_v48 = vpack.c.bf16 %v526_v44, %v524_v0  ;;  %v393_v0 = vld [vmem:[%s1572_s3] sm:$0xff]  ;;  %v396_v2 = vld [vmem:[%s1572_s3 + $0x18] sm:$0xff] }
  0xad   : > { %1032 = vmatprep.subr.bf16.mxu0 %v1031_v47 }
  0xae   : > { %1034 = vmatpush1.bf16.msra.mxu0 %v1033_v48 }
  0xaf   : > { %v535_v53 = vpop.permute.xlu1 %534  ;;  %v533_v54 = vpop.permute.xlu0 %532 }
  0xb0   : > { %v538_v1 = vsel %vm536_vm6, %v531_v4, %v535_v53  ;;  %v540_v3 = vsel %vm536_vm6, %v535_v53, %v531_v4  ;;  %v537_v5 = vsel %vm536_vm6, %v529_v46, %v533_v54  ;;  %v539_v56 = vsel %vm536_vm6, %v533_v54, %v529_v46  ;;  %v395_v4 = vld [vmem:[%s1572_s3 + $0x10] sm:$0xff] }
  0xb1   : > { %v551_v57 = vmul.f32 %v1378_v49, %v538_v1  ;;  %v552_v58 = vmul.f32 %v1381_v50, %v540_v3  ;;  %v549_v59 = vmul.f32 %v1378_v49, %v537_v5  ;;  %v550_v10 = vmul.f32 %v1381_v50, %v539_v56  ;;  %v397_v5 = vld [vmem:[%s1573_s4] sm:$0xff] }
  0xb2   : > { %v1100_v56 = vmov 0.0  }
  0xb3   : > { %v556_v60 = vpop.permute.xlu1 %555  ;;  %v554_v61 = vpop.permute.xlu0 %553  ;;  %v1035_v62 = vpack.c.bf16 %v552_v58, %v550_v10  ;;  %v1037_v63 = vpack.c.bf16 %v551_v57, %v549_v59  ;;  %844 = vmatprep.mubr.f32.mxu1 %v1100_v56  ;;  %v400_v57 = vld [vmem:[%s1575_s6] sm:$0xff] }
  0xb5   : > { %1036 = vmatprep.subr.bf16.mxu0 %v1035_v62 }
  0xb6   : > { %1038 = vmatpush1.bf16.msra.mxu0 %v1037_v63 }
  0xb7   : > { %v560_v8 = vpop.permute.xlu1 %559  ;;  %v558_v9 = vpop.permute.xlu0 %557 }
  0xb8   : > { %v563_v16 = vsel %vm561_vm7, %v556_v60, %v560_v8  ;;  %v565_v19 = vsel %vm561_vm7, %v560_v8, %v556_v60  ;;  %v562_v20 = vsel %vm561_vm7, %v554_v61, %v558_v9  ;;  %v564_v21 = vsel %vm561_vm7, %v558_v9, %v554_v61 }
  0xb9   : > { %v576_v13 = vmul.f32 %v1398_v6, %v563_v16  ;;  %v577_v14 = vmul.f32 %v1401_v7, %v565_v19  ;;  %v574_v22 = vmul.f32 %v1398_v6, %v562_v20  ;;  %v575_v23 = vmul.f32 %v1401_v7, %v564_v21 }
  0xbb   : > { %v581_v24 = vpop.permute.xlu1 %580  ;;  %v579_v25 = vpop.permute.xlu0 %578  ;;  %v1039_v26 = vpack.c.bf16 %v577_v14, %v575_v23  ;;  %v1041_v27 = vpack.c.bf16 %v576_v13, %v574_v22 }
  0xbd   : > { %1040 = vmatprep.subr.bf16.mxu0 %v1039_v26 }
  0xbe   : > { %1042 = vmatpush1.bf16.msra.mxu0 %v1041_v27 }
  0xbf   : > { %v585_v30 = vpop.permute.xlu1 %584  ;;  %v583_v31 = vpop.permute.xlu0 %582 }
  0xc0   : > { %v588_v32 = vsel %vm586_vm8, %v581_v24, %v585_v30  ;;  %v590_v37 = vsel %vm586_vm8, %v585_v30, %v581_v24  ;;  %v587_v38 = vsel %vm586_vm8, %v579_v25, %v583_v31  ;;  %v589_v39 = vsel %vm586_vm8, %v583_v31, %v579_v25 }
  0xc1   : > { %v601_v40 = vmul.f32 %v1419_v28, %v588_v32  ;;  %v602_v41 = vmul.f32 %v1424_v29, %v590_v37  ;;  %v599_v42 = vmul.f32 %v1419_v28, %v587_v38  ;;  %v600_v43 = vmul.f32 %v1424_v29, %v589_v39 }
  0xc3   : > { %v1043_v44 = vpack.c.bf16 %v602_v41, %v600_v43  ;;  %v1045_v45 = vpack.c.bf16 %v601_v40, %v599_v42 }
  0xc5   : > { %1044 = vmatprep.subr.bf16.mxu0 %v1043_v44 }
  0xc6   : > { %1046 = vmatpush1.bf16.msra.mxu0 %v1045_v45 }
  0xc9   : > { %685 = vmatmul.mubr.f32.vlgmr.msra.gmra.mrb[0].mxu0 %v393_v0 }
  0xca   : > { %1007 = vmatprep.mubr.msk.f32.mxu0 %vm613_vm0, %v396_v2 }
  0xcd   : > { %691 = vmatmul.mubr.f32.gmra.mrb[2].mxu0 %v395_v4 }
  0xd0   : > { %v611_v48 = vpop.permute.xlu0 %610 }
 0x19c   : > { %v1448_v46 = vpop.f32.mrb[0].mxu0 }
 0x19d   : > { %v1450_v47 = vpop.f32.mrb[1].mxu0 }
 0x1a0   : > { %v692_v53 = vpop.f32.mrb[2].mxu0 }
 0x1a1   : > { %v1453_v54 = vadd.f32 %v692_v53, %v611_v48  ;;  %v694_v55 = vpop.f32.mrb[3].mxu0 }
 0x1a2   : > { %v1455_v1 = vadd.f32 %v694_v55, %v611_v48 }
 0x1a3   : > { %715 = vrot.lane.b32.xlu0 %v1453_v54, %s1092_s20  ;;  %707 = vrot.lane.b32.xlu1 %v1453_v54, %s1091_s19 }
 0x1a4   : > { %v704_v3 = vcombine.low %v1453_v54, %v1455_v1 }
 0x1a6   : > { %706 = vst [vmem:[%s377_s27] sm:$0xff] %v704_v3 }
 0x1a7   : > { %723 = vrot.lane.b32.xlu0 %v1453_v54, %s1093_s21  ;;  %709 = vrot.lane.b32.xlu1 %v1455_v1, %s1091_s19 }
 0x1ab   : > { %731 = vrot.lane.b32.xlu0 %v1453_v54, %s1094_s22  ;;  %717 = vrot.lane.b32.xlu1 %v1455_v1, %s1092_s20 }
 0x1af   : > { %739 = vrot.lane.b32.xlu0 %v1453_v54, %s1095_s23  ;;  %725 = vrot.lane.b32.xlu1 %v1455_v1, %s1093_s21 }
 0x1b3   : > { %747 = vrot.lane.b32.xlu0 %v1453_v54, %s1096_s24  ;;  %733 = vrot.lane.b32.xlu1 %v1455_v1, %s1094_s22 }
 0x1b7   : > { %755 = vrot.lane.b32.xlu0 %v1453_v54, %s1097_s25  ;;  %741 = vrot.lane.b32.xlu1 %v1455_v1, %s1095_s23 }
 0x1bb   : > { %763 = vrot.lane.b32.xlu0 %v1453_v54, %s1098_s28  ;;  %749 = vrot.lane.b32.xlu1 %v1455_v1, %s1096_s24 }
 0x1bf   : > { %605 = vperm.xlu0 %1081, %v397_v5   ;;  %757 = vrot.lane.b32.xlu1 %v1455_v1, %s1097_s25 }
 0x1c3   : > { %765 = vrot.lane.b32.xlu1 %v1455_v1, %s1098_s28 }
 0x1c7   : > { %773 = vperm.xlu1 %1082, %v400_v57  }
 0x215   : > { %v716_v58 = vpop.permute.xlu0 %715  ;;  %v708_v59 = vpop.permute.xlu1 %707 }
 0x219   : > { %v724_v10 = vpop.permute.xlu0 %723  ;;  %v710_v60 = vpop.permute.xlu1 %709 }
 0x21a   : > { %v711_v61 = vsel %vm411_vm1, %v708_v59, %v710_v60  ;;  %v712_v62 = vsel %vm411_vm1, %v710_v60, %v708_v59 }
 0x21b   : > { %v713_v19 = vmul.f32 %v712_v62, %v1272_v17  ;;  %v714_v21 = vmul.f32 %v711_v61, %v1275_v18 }
 0x21d   : > { %v732_v63 = vpop.permute.xlu0 %731  ;;  %v718_v8 = vpop.permute.xlu1 %717 }
 0x21e   : > { %v719_v9 = vsel %vm436_vm2, %v716_v58, %v718_v8  ;;  %v720_v16 = vsel %vm436_vm2, %v718_v8, %v716_v58 }
 0x21f   : > { %v721_v20 = vmul.f32 %v720_v16, %v1292_v34  ;;  %v722_v13 = vmul.f32 %v719_v9, %v1295_v35 }
 0x221   : > { %v726_v14 = vpop.permute.xlu1 %725  ;;  %v1047_v22 = vpack.c.bf16 %v722_v13, %v714_v21  ;;  %v1049_v23 = vpack.c.bf16 %v721_v20, %v713_v19  ;;  %v740_v24 = vpop.permute.xlu0 %739 }
 0x222   : > { %v727_v25 = vsel %vm461_vm3, %v724_v10, %v726_v14  ;;  %v728_v26 = vsel %vm461_vm3, %v726_v14, %v724_v10 }
 0x223   : > { %1048 = vmatprep.subr.bf16.mxu1 %v1047_v22  ;;  %v729_v34 = vmul.f32 %v728_v26, %v1312_v51  ;;  %v730_v35 = vmul.f32 %v727_v25, %v1315_v52 }
 0x224   : > { %1050 = vmatpush1.bf16.msra.mxu1 %v1049_v23 }
 0x225   : > { %v734_v27 = vpop.permute.xlu1 %733  ;;  %v748_v32 = vpop.permute.xlu0 %747 }
 0x226   : > { %v735_v17 = vsel %vm486_vm4, %v732_v63, %v734_v27  ;;  %v736_v18 = vsel %vm486_vm4, %v734_v27, %v732_v63 }
 0x227   : > { %v737_v30 = vmul.f32 %v736_v18, %v1332_v12  ;;  %v738_v31 = vmul.f32 %v735_v17, %v1335_v15 }
 0x229   : > { %v742_v37 = vpop.permute.xlu1 %741  ;;  %v1051_v38 = vpack.c.bf16 %v738_v31, %v730_v35  ;;  %v1053_v39 = vpack.c.bf16 %v737_v30, %v729_v34  ;;  %v756_v43 = vpop.permute.xlu0 %755 }
 0x22a   : > { %v743_v40 = vsel %vm511_vm5, %v740_v24, %v742_v37  ;;  %v744_v41 = vsel %vm511_vm5, %v742_v37, %v740_v24 }
 0x22b   : > { %v745_v42 = vmul.f32 %v743_v40, %v1352_v33  ;;  %v746_v51 = vmul.f32 %v744_v41, %v1355_v36  ;;  %1052 = vmatprep.subr.bf16.mxu1 %v1051_v38 }
 0x22c   : > { %1054 = vmatpush1.bf16.msra.mxu1 %v1053_v39 }
 0x22d   : > { %v750_v52 = vpop.permute.xlu1 %749  ;;  %v1055_v12 = vpack.c.bf16 %v746_v51, %v1455_v1  ;;  %v1057_v15 = vpack.c.bf16 %v745_v42, %v1453_v54  ;;  %v764_v54 = vpop.permute.xlu0 %763 }
 0x22e   : > { %v751_v44 = vsel %vm536_vm6, %v748_v32, %v750_v52  ;;  %v752_v45 = vsel %vm536_vm6, %v750_v52, %v748_v32 }
 0x22f   : > { %1056 = vmatprep.subr.bf16.mxu1 %v1055_v12  ;;  %v753_v2 = vmul.f32 %v751_v44, %v1378_v49  ;;  %v754_v4 = vmul.f32 %v752_v45, %v1381_v50  ;;  %v399_v50 = vld [vmem:[%s1574_s5] sm:$0xff] }
 0x230   : > { %1058 = vmatpush1.bf16.msra.mxu1 %v1057_v15 }
 0x231   : > { %v758_v0 = vpop.permute.xlu1 %757 }
 0x232   : > { %v759_v33 = vsel %vm561_vm7, %v756_v43, %v758_v0  ;;  %v760_v36 = vsel %vm561_vm7, %v758_v0, %v756_v43 }
 0x233   : > { %v761_v48 = vmul.f32 %v759_v33, %v1398_v6  ;;  %v762_v53 = vmul.f32 %v760_v36, %v1401_v7 }
 0x235   : > { %v766_v55 = vpop.permute.xlu1 %765  ;;  %v1059_v1 = vpack.c.bf16 %v762_v53, %v754_v4  ;;  %v1061_v3 = vpack.c.bf16 %v761_v48, %v753_v2 }
 0x236   : > { %v768_v5 = vsel %vm586_vm8, %v766_v55, %v764_v54  ;;  %v767_v56 = vsel %vm586_vm8, %v764_v54, %v766_v55 }
 0x237   : > { %v770_v57 = vmul.f32 %v1424_v29, %v768_v5  ;;  %1060 = vmatprep.subr.bf16.mxu1 %v1059_v1  ;;  %v769_v49 = vmul.f32 %v1419_v28, %v767_v56 }
 0x238   : > { %1062 = vmatpush1.bf16.msra.mxu1 %v1061_v3 }
 0x239   : > { %796 = vmatprep.subr.mxu1 %v770_v57 }
 0x23c   : > { %797 = vmatpush1.msra.mxu1 %v769_v49 }
 0x23d   : > { %1008 = vmatmul.mubr.msk.f32.vlgmr.msra.gmra.mrb[0].mxu1 %vm776_vm9, %v399_v50 }
 0x23e   : > { %v606_v6 = vpop.permute.xlu0 %605 }
 0x23f   : > { %v687_v7 = vadd.f32 %v1448_v46, %v606_v6  ;;  %v689_v11 = vadd.f32 %v1450_v47, %v606_v6 }
 0x241   : > { %v699_v29 = vcombine.low %v687_v7, %v689_v11 }
 0x243   : > { %701 = vst [vmem:[%s371_s29] sm:$0xff] %v699_v29 }
 0x246   : > { %v774_v28 = vpop.permute.xlu1 %773 }
 0x310   : > { %v846_v58 = vpop.f32.mrb[0].mxu1 }
 0x311   : > { %v847_v59 = vadd.f32 %v846_v58, %v774_v28  ;;  %v848_v10 = vpop.f32.mrb[1].mxu1 }
 0x312   : > { %v849_v60 = vadd.f32 %v848_v10, %v774_v28 }
 0x313   : > { %851 = vst [vmem:[%s383_s14] sm:$0xff] %v847_v59 }
 0x314   : > { %852 = vst [vmem:[%s383_s14 + $0x8] sm:$0xff] %v849_v60 }
 0x315 PF: > { %s20_s30 = sadd.s32 1, %s1089_s30  }
 0x316   : > { %p17_p4 = scmp.ge.s32.totalorder %s20_s30, 4  }
 0x318   :  { %19 = sbr.rel (!%p17_p4) target bundleno = 1 (0x1), region = 105 }

</bundles_post_ra>
